<compile_context>
chip_gen: v7x
topology: tpu7x:2x2x1
jax: 0.10.0
libtpu: 0.0.40
codegen_flags: <defaults>
</compile_context>

<pallas_src>
import functools

import jax
import jax.numpy as jnp
from jax import lax
from jax.experimental import pallas as pl
from jax.experimental.pallas import tpu as pltpu


# NT matmul dimension numbers: contract the minor axis of BOTH operands,
#   (f_out, f_in) x (tile_b, f_in) -> (f_out, tile_b)
# This is the same pattern the official Pallas TPU flash-attention kernel uses,
# and it avoids any host- or kernel-side transpose of the big operand.
_NT_DIMS = (((1,), (1,)), ((), ()))


def _vpu_linear(w, b, h):
    """Tiny Linear as VPU broadcast multiply-adds (batch on the lane axis).

    w: (f_out, f_in) with f_in, f_out <= 8;  b: (f_out, 1);  h: (f_in, tile_b).
    Returns (f_out, tile_b) without touching the MXU.
    """
    acc = b + w[:, 0:1] * h[0:1, :]
    for k in range(1, w.shape[1]):                      # unrolled: f_in <= 8
        acc = acc + w[:, k:k + 1] * h[k:k + 1, :]
    return acc


def mlp_kernel(x_ref, w1_ref, b1_ref, w2_ref, b2_ref, w3_ref, b3_ref,
               w4_ref, b4_ref, o_ref, *, use_bf16):
    # x_ref: (tile_b, 8) block straight out of HBM (no host transpose / pad)
    # o_ref: (1, tile_b) lane-dense output block
    x = x_ref[...]
    w1, b1 = w1_ref[...], b1_ref[...]
    w2, b2 = w2_ref[...], b2_ref[...]
    w3, b3 = w3_ref[...], b3_ref[...]
    w4, b4 = w4_ref[...], b4_ref[...]

    if use_bf16:                                        # opt-in single-pass MXU
        x = x.astype(jnp.bfloat16)
        w1 = w1.astype(jnp.bfloat16)
        w2 = w2.astype(jnp.bfloat16)

    # Layer 1 (MXU): contract x's feature axis directly -> batch lands on lanes.
    h = lax.dot_general(w1, x, _NT_DIMS, preferred_element_type=jnp.float32)
    h = jnp.maximum(h + b1, 0.0)                        # (16, tile_b) f32

    if use_bf16:
        h = h.astype(jnp.bfloat16)

    # Layer 2 (MXU): batch stays on the 128-lane axis.
    h = jnp.dot(w2, h, preferred_element_type=jnp.float32)
    h = jnp.maximum(h + b2, 0.0)                        # (8, tile_b) f32

    # Layers 3 and 4 (VPU): M/K in {1,4,8} -> broadcast FMAs, no MXU streaming.
    h = jnp.maximum(_vpu_linear(w3, b3, h), 0.0)        # (4, tile_b)
    out = _vpu_linear(w4, b4, h)                        # (1, tile_b)

    o_ref[...] = out.astype(o_ref.dtype)


def _round_up(n, m):
    return ((n + m - 1) // m) * m


@functools.partial(jax.jit, static_argnames=("tile_b", "use_bf16"))
def net_forward(x, params, *, tile_b=16384, use_bf16=False):
    """Forward pass of Net.  x: (B, 8) float32 -> (B, 1) float32."""
    B, F = x.shape
    assert F == 8, x.shape

    w1, b1 = params["w1"], params["b1"].reshape(16, 1)
    w2, b2 = params["w2"], params["b2"].reshape(8, 1)
    w3, b3 = params["w3"], params["b3"].reshape(4, 1)
    w4, b4 = params["w4"], params["b4"].reshape(1, 1)

    # ---- tile selection (no host pad: ragged final tile is masked by Pallas) --
    # Cap keeps the lane-padded (tile, 8) input blocks comfortably inside v7x's
    # 64 MiB VMEM; raise tile_b + vmem_limit_bytes on v5e/v6e (128 MiB) if desired.
    tile_b = max(8, min(tile_b, 16384))
    if B <= 128:
        tile = B                                   # single exact block
    else:
        tile = min(_round_up(tile_b, 128), _round_up(B, 128))
        if pl.cdiv(B, tile) < 2:                   # >= 2 steps -> megacore (v7x)
            tile = max(128, _round_up(pl.cdiv(B, 2), 128))
    num_tiles = pl.cdiv(B, tile)

    flops = 2 * (8 * 16 + 16 * 8 + 8 * 4 + 4 * 1) * B
    bytes_accessed = B * (8 * 4 + 4) + 4 * (16 * 9 + 8 * 17 + 4 * 9 + 5)

    kernel = functools.partial(mlp_kernel, use_bf16=use_bf16)
    const = lambda i: (0, 0)                       # params: fetched once, resident

    out = pl.pallas_call(
        kernel,
        out_shape=jax.ShapeDtypeStruct((1, B), jnp.float32),
        grid=(num_tiles,),
        in_specs=[
            pl.BlockSpec((tile, 8), lambda i: (i, 0)),   # stream batch tiles of x
            pl.BlockSpec((16, 8), const),                # w1
            pl.BlockSpec((16, 1), const),                # b1
            pl.BlockSpec((8, 16), const),                # w2
            pl.BlockSpec((8, 1), const),                 # b2
            pl.BlockSpec((4, 8), const),                 # w3
            pl.BlockSpec((4, 1), const),                 # b3
            pl.BlockSpec((1, 4), const),                 # w4
            pl.BlockSpec((1, 1), const),                 # b4
        ],
        out_specs=pl.BlockSpec((1, tile), lambda i: (0, i)),   # lane-dense stores
        compiler_params=pltpu.CompilerParams(
            dimension_semantics=("parallel",),            # shard batch on v7x cores
            vmem_limit_bytes=48 * 1024 * 1024,            # > default scoped limits
        ),
        cost_estimate=pl.CostEstimate(
            flops=flops, transcendentals=0, bytes_accessed=bytes_accessed),
    )(x, w1, b1, w2, b2, w3, b3, w4, b4)

    # (1, B) -> (B, 1): same linear order, negligible (4 B/row) host reshape.
    return out.reshape(B, 1)


def init_params(key):
    """PyTorch-style Linear init: U(-1/sqrt(fan_in), +1/sqrt(fan_in)); W is (out, in)."""
    dims = [(8, 16), (16, 8), (8, 4), (4, 1)]  # (in_features, out_features)
    params = {}
    for i, (fan_in, fan_out) in enumerate(dims, start=1):
        key, kw, kb = jax.random.split(key, 3)
        bound = 1.0 / (fan_in ** 0.5)
        params[f"w{i}"] = jax.random.uniform(
            kw, (fan_out, fan_in), jnp.float32, minval=-bound, maxval=bound)
        params[f"b{i}"] = jax.random.uniform(
            kb, (fan_out,), jnp.float32, minval=-bound, maxval=bound)
    return params


def reference_forward(x, p):
    h = jnp.maximum(x @ p["w1"].T + p["b1"], 0.0)
    h = jnp.maximum(h @ p["w2"].T + p["b2"], 0.0)
    h = jnp.maximum(h @ p["w3"].T + p["b3"], 0.0)
    return h @ p["w4"].T + p["b4"]


if __name__ == "__main__":
    key = jax.random.PRNGKey(0)
    key, kx1, kx2 = jax.random.split(key, 3)
    params = init_params(key)

    # Small batch: single exact (8, 8) block, grid of 1.
    x1 = jax.random.normal(kx1, (8, 8), jnp.float32)
    out1 = jax.block_until_ready(net_forward(x1, params))
    ref1 = reference_forward(x1, params)
    assert out1.shape == (8, 1), out1.shape
    assert jnp.allclose(out1, ref1, atol=1e-5, rtol=1e-5)

    # Ragged batch, default tile -> split into 2 tiles of 256 (2nd is partial).
    x2 = jax.random.normal(kx2, (300, 8), jnp.float32)
    out2 = jax.block_until_ready(net_forward(x2, params))
    ref2 = reference_forward(x2, params)
    assert out2.shape == (300, 1), out2.shape
    assert jnp.allclose(out2, ref2, atol=1e-5, rtol=1e-5)

    # Explicit small tile -> 3-step grid with a masked partial final tile.
    out3 = jax.block_until_ready(net_forward(x2, params, tile_b=128))
    assert jnp.allclose(out3, ref2, atol=1e-5, rtol=1e-5)

    # Opt-in bf16 MXU path (f32 accumulation); looser parity by design.
    out4 = jax.block_until_ready(net_forward(x2, params, use_bf16=True))
    assert jnp.allclose(out4, ref2, atol=5e-2, rtol=5e-2)

    print("KERNEL_OK")
</pallas_src>

<mosaic_0001>
module attributes {stable_mosaic.version = 11 : i64} {
  func.func @mlp_kernel(%arg0: i32, %arg1: memref<8x8xf32, #tpu.memory_space<vmem>>, %arg2: memref<16x8xf32, #tpu.memory_space<vmem>>, %arg3: memref<16x1xf32, #tpu.memory_space<vmem>>, %arg4: memref<8x16xf32, #tpu.memory_space<vmem>>, %arg5: memref<8x1xf32, #tpu.memory_space<vmem>>, %arg6: memref<4x8xf32, #tpu.memory_space<vmem>>, %arg7: memref<4x1xf32, #tpu.memory_space<vmem>>, %arg8: memref<1x4xf32, #tpu.memory_space<vmem>>, %arg9: memref<1x1xf32, #tpu.memory_space<vmem>>, %arg10: memref<1x8xf32, #tpu.memory_space<vmem>>) attributes {dimension_semantics = [#tpu.dimension_semantics<parallel>], iteration_bounds = array<i64: 1>, scalar_prefetch = 0 : i64, scratch_operands = 0 : i64, tpu.core_type = #tpu.core_type<tc>, window_params = [{transform_indices = @transform_0, window_bounds = array<i64: 8, 8>}, {pipeline_mode = #tpu.pipeline_mode<synchronous>, transform_indices = @transform_1, window_bounds = array<i64: 16, 8>}, {pipeline_mode = #tpu.pipeline_mode<synchronous>, transform_indices = @transform_2, window_bounds = array<i64: 16, 1>}, {pipeline_mode = #tpu.pipeline_mode<synchronous>, transform_indices = @transform_3, window_bounds = array<i64: 8, 16>}, {pipeline_mode = #tpu.pipeline_mode<synchronous>, transform_indices = @transform_4, window_bounds = array<i64: 8, 1>}, {pipeline_mode = #tpu.pipeline_mode<synchronous>, transform_indices = @transform_5, window_bounds = array<i64: 4, 8>}, {pipeline_mode = #tpu.pipeline_mode<synchronous>, transform_indices = @transform_6, window_bounds = array<i64: 4, 1>}, {pipeline_mode = #tpu.pipeline_mode<synchronous>, transform_indices = @transform_7, window_bounds = array<i64: 1, 4>}, {pipeline_mode = #tpu.pipeline_mode<synchronous>, transform_indices = @transform_8, window_bounds = array<i64: 1, 1>}, {transform_indices = @transform_9, window_bounds = array<i64: 1, 8>}]} {
    %c0 = arith.constant 0 : index
    %c0_0 = arith.constant 0 : index
    %0 = vector.load %arg1[%c0, %c0_0] : memref<8x8xf32, #tpu.memory_space<vmem>>, vector<8x8xf32>
    %c0_1 = arith.constant 0 : index
    %c0_2 = arith.constant 0 : index
    %1 = vector.load %arg2[%c0_1, %c0_2] : memref<16x8xf32, #tpu.memory_space<vmem>>, vector<16x8xf32>
    %c0_3 = arith.constant 0 : index
    %c0_4 = arith.constant 0 : index
    %2 = vector.load %arg3[%c0_3, %c0_4] : memref<16x1xf32, #tpu.memory_space<vmem>>, vector<16x1xf32>
    %c0_5 = arith.constant 0 : index
    %c0_6 = arith.constant 0 : index
    %3 = vector.load %arg4[%c0_5, %c0_6] : memref<8x16xf32, #tpu.memory_space<vmem>>, vector<8x16xf32>
    %c0_7 = arith.constant 0 : index
    %c0_8 = arith.constant 0 : index
    %4 = vector.load %arg5[%c0_7, %c0_8] : memref<8x1xf32, #tpu.memory_space<vmem>>, vector<8x1xf32>
    %c0_9 = arith.constant 0 : index
    %c0_10 = arith.constant 0 : index
    %5 = vector.load %arg6[%c0_9, %c0_10] : memref<4x8xf32, #tpu.memory_space<vmem>>, vector<4x8xf32>
    %c0_11 = arith.constant 0 : index
    %c0_12 = arith.constant 0 : index
    %6 = vector.load %arg7[%c0_11, %c0_12] : memref<4x1xf32, #tpu.memory_space<vmem>>, vector<4x1xf32>
    %c0_13 = arith.constant 0 : index
    %c0_14 = arith.constant 0 : index
    %7 = vector.load %arg8[%c0_13, %c0_14] : memref<1x4xf32, #tpu.memory_space<vmem>>, vector<1x4xf32>
    %c0_15 = arith.constant 0 : index
    %c0_16 = arith.constant 0 : index
    %8 = vector.load %arg9[%c0_15, %c0_16] : memref<1x1xf32, #tpu.memory_space<vmem>>, vector<1x1xf32>
    %cst = arith.constant dense<0.000000e+00> : vector<16x8xf32>
    %9 = tpu.matmul %1, %0, %cst {dimension_numbers = #tpu.dot_dimension_numbers<[1], [1], [0], [0], [0, 0, 1, 0], [], []>} : vector<16x8xf32>, vector<8x8xf32>, vector<16x8xf32> -> vector<16x8xf32>
    %10 = vector.broadcast %2 : vector<16x1xf32> to vector<16x8xf32>
    %11 = arith.addf %9, %10 : vector<16x8xf32>
    %cst_17 = arith.constant 0.000000e+00 : f32
    %12 = vector.broadcast %cst_17 : f32 to vector<16x8xf32>
    %13 = arith.maximumf %11, %12 : vector<16x8xf32>
    %cst_18 = arith.constant dense<0.000000e+00> : vector<8x8xf32>
    %14 = tpu.matmul %3, %13, %cst_18 {dimension_numbers = #tpu.dot_dimension_numbers<[1], [0], [0], [1], [0, 0, 1, 1], [], []>} : vector<8x16xf32>, vector<16x8xf32>, vector<8x8xf32> -> vector<8x8xf32>
    %15 = vector.broadcast %4 : vector<8x1xf32> to vector<8x8xf32>
    %16 = arith.addf %14, %15 : vector<8x8xf32>
    %cst_19 = arith.constant 0.000000e+00 : f32
    %17 = vector.broadcast %cst_19 : f32 to vector<8x8xf32>
    %18 = arith.maximumf %16, %17 : vector<8x8xf32>
    %19 = vector.extract_strided_slice %5 {offsets = [0, 0], sizes = [4, 1], strides = [1, 1]} : vector<4x8xf32> to vector<4x1xf32>
    %20 = vector.extract_strided_slice %18 {offsets = [0, 0], sizes = [1, 8], strides = [1, 1]} : vector<8x8xf32> to vector<1x8xf32>
    %21 = vector.broadcast %19 : vector<4x1xf32> to vector<4x8xf32>
    %22 = vector.broadcast %20 : vector<1x8xf32> to vector<4x8xf32>
    %23 = arith.mulf %21, %22 : vector<4x8xf32>
    %24 = vector.broadcast %6 : vector<4x1xf32> to vector<4x8xf32>
    %25 = arith.addf %24, %23 : vector<4x8xf32>
    %26 = vector.extract_strided_slice %5 {offsets = [0, 1], sizes = [4, 1], strides = [1, 1]} : vector<4x8xf32> to vector<4x1xf32>
    %27 = vector.extract_strided_slice %18 {offsets = [1, 0], sizes = [1, 8], strides = [1, 1]} : vector<8x8xf32> to vector<1x8xf32>
    %28 = vector.broadcast %26 : vector<4x1xf32> to vector<4x8xf32>
    %29 = vector.broadcast %27 : vector<1x8xf32> to vector<4x8xf32>
    %30 = arith.mulf %28, %29 : vector<4x8xf32>
    %31 = arith.addf %25, %30 : vector<4x8xf32>
    %32 = vector.extract_strided_slice %5 {offsets = [0, 2], sizes = [4, 1], strides = [1, 1]} : vector<4x8xf32> to vector<4x1xf32>
    %33 = vector.extract_strided_slice %18 {offsets = [2, 0], sizes = [1, 8], strides = [1, 1]} : vector<8x8xf32> to vector<1x8xf32>
    %34 = vector.broadcast %32 : vector<4x1xf32> to vector<4x8xf32>
    %35 = vector.broadcast %33 : vector<1x8xf32> to vector<4x8xf32>
    %36 = arith.mulf %34, %35 : vector<4x8xf32>
    %37 = arith.addf %31, %36 : vector<4x8xf32>
    %38 = vector.extract_strided_slice %5 {offsets = [0, 3], sizes = [4, 1], strides = [1, 1]} : vector<4x8xf32> to vector<4x1xf32>
    %39 = vector.extract_strided_slice %18 {offsets = [3, 0], sizes = [1, 8], strides = [1, 1]} : vector<8x8xf32> to vector<1x8xf32>
    %40 = vector.broadcast %38 : vector<4x1xf32> to vector<4x8xf32>
    %41 = vector.broadcast %39 : vector<1x8xf32> to vector<4x8xf32>
    %42 = arith.mulf %40, %41 : vector<4x8xf32>
    %43 = arith.addf %37, %42 : vector<4x8xf32>
    %44 = vector.extract_strided_slice %5 {offsets = [0, 4], sizes = [4, 1], strides = [1, 1]} : vector<4x8xf32> to vector<4x1xf32>
    %45 = vector.extract_strided_slice %18 {offsets = [4, 0], sizes = [1, 8], strides = [1, 1]} : vector<8x8xf32> to vector<1x8xf32>
    %46 = vector.broadcast %44 : vector<4x1xf32> to vector<4x8xf32>
    %47 = vector.broadcast %45 : vector<1x8xf32> to vector<4x8xf32>
    %48 = arith.mulf %46, %47 : vector<4x8xf32>
    %49 = arith.addf %43, %48 : vector<4x8xf32>
    %50 = vector.extract_strided_slice %5 {offsets = [0, 5], sizes = [4, 1], strides = [1, 1]} : vector<4x8xf32> to vector<4x1xf32>
    %51 = vector.extract_strided_slice %18 {offsets = [5, 0], sizes = [1, 8], strides = [1, 1]} : vector<8x8xf32> to vector<1x8xf32>
    %52 = vector.broadcast %50 : vector<4x1xf32> to vector<4x8xf32>
    %53 = vector.broadcast %51 : vector<1x8xf32> to vector<4x8xf32>
    %54 = arith.mulf %52, %53 : vector<4x8xf32>
    %55 = arith.addf %49, %54 : vector<4x8xf32>
    %56 = vector.extract_strided_slice %5 {offsets = [0, 6], sizes = [4, 1], strides = [1, 1]} : vector<4x8xf32> to vector<4x1xf32>
    %57 = vector.extract_strided_slice %18 {offsets = [6, 0], sizes = [1, 8], strides = [1, 1]} : vector<8x8xf32> to vector<1x8xf32>
    %58 = vector.broadcast %56 : vector<4x1xf32> to vector<4x8xf32>
    %59 = vector.broadcast %57 : vector<1x8xf32> to vector<4x8xf32>
    %60 = arith.mulf %58, %59 : vector<4x8xf32>
    %61 = arith.addf %55, %60 : vector<4x8xf32>
    %62 = vector.extract_strided_slice %5 {offsets = [0, 7], sizes = [4, 1], strides = [1, 1]} : vector<4x8xf32> to vector<4x1xf32>
    %63 = vector.extract_strided_slice %18 {offsets = [7, 0], sizes = [1, 8], strides = [1, 1]} : vector<8x8xf32> to vector<1x8xf32>
    %64 = vector.broadcast %62 : vector<4x1xf32> to vector<4x8xf32>
    %65 = vector.broadcast %63 : vector<1x8xf32> to vector<4x8xf32>
    %66 = arith.mulf %64, %65 : vector<4x8xf32>
    %67 = arith.addf %61, %66 : vector<4x8xf32>
    %cst_20 = arith.constant 0.000000e+00 : f32
    %68 = vector.broadcast %cst_20 : f32 to vector<4x8xf32>
    %69 = arith.maximumf %67, %68 : vector<4x8xf32>
    %70 = vector.extract_strided_slice %7 {offsets = [0, 0], sizes = [1, 1], strides = [1, 1]} : vector<1x4xf32> to vector<1x1xf32>
    %71 = vector.extract_strided_slice %69 {offsets = [0, 0], sizes = [1, 8], strides = [1, 1]} : vector<4x8xf32> to vector<1x8xf32>
    %72 = vector.broadcast %70 : vector<1x1xf32> to vector<1x8xf32>
    %73 = arith.mulf %72, %71 : vector<1x8xf32>
    %74 = vector.broadcast %8 : vector<1x1xf32> to vector<1x8xf32>
    %75 = arith.addf %74, %73 : vector<1x8xf32>
    %76 = vector.extract_strided_slice %7 {offsets = [0, 1], sizes = [1, 1], strides = [1, 1]} : vector<1x4xf32> to vector<1x1xf32>
    %77 = vector.extract_strided_slice %69 {offsets = [1, 0], sizes = [1, 8], strides = [1, 1]} : vector<4x8xf32> to vector<1x8xf32>
    %78 = vector.broadcast %76 : vector<1x1xf32> to vector<1x8xf32>
    %79 = arith.mulf %78, %77 : vector<1x8xf32>
    %80 = arith.addf %75, %79 : vector<1x8xf32>
    %81 = vector.extract_strided_slice %7 {offsets = [0, 2], sizes = [1, 1], strides = [1, 1]} : vector<1x4xf32> to vector<1x1xf32>
    %82 = vector.extract_strided_slice %69 {offsets = [2, 0], sizes = [1, 8], strides = [1, 1]} : vector<4x8xf32> to vector<1x8xf32>
    %83 = vector.broadcast %81 : vector<1x1xf32> to vector<1x8xf32>
    %84 = arith.mulf %83, %82 : vector<1x8xf32>
    %85 = arith.addf %80, %84 : vector<1x8xf32>
    %86 = vector.extract_strided_slice %7 {offsets = [0, 3], sizes = [1, 1], strides = [1, 1]} : vector<1x4xf32> to vector<1x1xf32>
    %87 = vector.extract_strided_slice %69 {offsets = [3, 0], sizes = [1, 8], strides = [1, 1]} : vector<4x8xf32> to vector<1x8xf32>
    %88 = vector.broadcast %86 : vector<1x1xf32> to vector<1x8xf32>
    %89 = arith.mulf %88, %87 : vector<1x8xf32>
    %90 = arith.addf %85, %89 : vector<1x8xf32>
    %c0_21 = arith.constant 0 : index
    %c0_22 = arith.constant 0 : index
    %91 = vector.load %arg10[%c0_21, %c0_22] : memref<1x8xf32, #tpu.memory_space<vmem>>, vector<1x8xf32>
    tpu.vector_store %arg10[%c0_21, %c0_22], %90 {strides = array<i32>} : memref<1x8xf32, #tpu.memory_space<vmem>>, vector<1x8xf32>,
    return
  }
  func.func @transform_0(%arg0: i32) -> (i32, i32) {
    %c0_i32 = arith.constant 0 : i32
    %c0_i32_0 = arith.constant 0 : i32
    return %arg0, %c0_i32 : i32, i32
  }
  func.func @transform_1(%arg0: i32) -> (i32, i32) {
    %c0_i32 = arith.constant 0 : i32
    %c0_i32_0 = arith.constant 0 : i32
    %c0_i32_1 = arith.constant 0 : i32
    return %c0_i32, %c0_i32_0 : i32, i32
  }
  func.func @transform_2(%arg0: i32) -> (i32, i32) {
    %c0_i32 = arith.constant 0 : i32
    %c0_i32_0 = arith.constant 0 : i32
    %c0_i32_1 = arith.constant 0 : i32
    return %c0_i32, %c0_i32_0 : i32, i32
  }
  func.func @transform_3(%arg0: i32) -> (i32, i32) {
    %c0_i32 = arith.constant 0 : i32
    %c0_i32_0 = arith.constant 0 : i32
    %c0_i32_1 = arith.constant 0 : i32
    return %c0_i32, %c0_i32_0 : i32, i32
  }
  func.func @transform_4(%arg0: i32) -> (i32, i32) {
    %c0_i32 = arith.constant 0 : i32
    %c0_i32_0 = arith.constant 0 : i32
    %c0_i32_1 = arith.constant 0 : i32
    return %c0_i32, %c0_i32_0 : i32, i32
  }
  func.func @transform_5(%arg0: i32) -> (i32, i32) {
    %c0_i32 = arith.constant 0 : i32
    %c0_i32_0 = arith.constant 0 : i32
    %c0_i32_1 = arith.constant 0 : i32
    return %c0_i32, %c0_i32_0 : i32, i32
  }
  func.func @transform_6(%arg0: i32) -> (i32, i32) {
    %c0_i32 = arith.constant 0 : i32
    %c0_i32_0 = arith.constant 0 : i32
    %c0_i32_1 = arith.constant 0 : i32
    return %c0_i32, %c0_i32_0 : i32, i32
  }
  func.func @transform_7(%arg0: i32) -> (i32, i32) {
    %c0_i32 = arith.constant 0 : i32
    %c0_i32_0 = arith.constant 0 : i32
    %c0_i32_1 = arith.constant 0 : i32
    return %c0_i32, %c0_i32_0 : i32, i32
  }
  func.func @transform_8(%arg0: i32) -> (i32, i32) {
    %c0_i32 = arith.constant 0 : i32
    %c0_i32_0 = arith.constant 0 : i32
    %c0_i32_1 = arith.constant 0 : i32
    return %c0_i32, %c0_i32_0 : i32, i32
  }
  func.func @transform_9(%arg0: i32) -> (i32, i32) {
    %c0_i32 = arith.constant 0 : i32
    %c0_i32_0 = arith.constant 0 : i32
    return %c0_i32, %arg0 : i32, i32
  }
}

</mosaic_0001>

<bundles_post_ra>
// kernel: net_forward.1
= control target key start
LH: loop header
LB: loop body
LE: loop exit
PB: predicated region body
PF: predicated region fallthrough
CT: control target
= control target key end

     0   :  { %s568_s0 = inlined_call_operand.vmem [shape: f32[8,8], index: 0, kind: input, shape index: {}]   ;;  %s569_s1 = inlined_call_operand.vmem [shape: f32[16,8], index: 1, kind: input, shape index: {}]   ;;  %s570_s2 = inlined_call_operand.vmem [shape: f32[16,1], index: 2, kind: input, shape index: {}]   ;;  %s571_s3 = inlined_call_operand.vmem [shape: f32[8,16], index: 3, kind: input, shape index: {}]   ;;  %s572_s4 = inlined_call_operand.vmem [shape: f32[8,1], index: 4, kind: input, shape index: {}]   ;;  %s573_s5 = inlined_call_operand.vmem [shape: f32[4,8], index: 5, kind: input, shape index: {}]   ;;  %s574_s6 = inlined_call_operand.vmem [shape: f32[4,1], index: 6, kind: input, shape index: {}]   ;;  %s575_s7 = inlined_call_operand.vmem [shape: f32[1,4], index: 7, kind: input, shape index: {}]   ;;  %s576_s8 = inlined_call_operand.<no memory space> [shape: f32[1,1], index: 8, kind: input, shape index: {}]   ;;  %s577_s9 = inlined_call_operand.hbm [shape: f32[1,8], index: 9, kind: output, shape index: {}]  }
   0x1   :  { %v14_v0 = vstv %s576_s8 }
   0x2   :  { %15 = vst [vmem:[#allocation2] sm:$0x1] %v14_v0 }
   0x3   :  { %v35_v1 = vld [vmem:[%s568_s0] sm:$0xff]  ;;  %vm56_vm0 = vcmask 64512   ;;  %v37_v4 = vld [vmem:[%s569_s1 + $0x8] sm:$0xff]  ;;  %v461_v5 = vmov 0  }
   0x4   :  { %v36_v2 = vld [vmem:[%s569_s1] sm:$0xff]  ;;  %395 = vmatprep.subr.msk.mxu0 %vm56_vm0, %v35_v1  ;;  %422 = vset.pattern.permute.xlu0 %v461_v5 }
   0x5   :  { %397 = vmatprep.mubr.msk.f32.mxu0 %vm56_vm0, %v36_v2  ;;  %v38_v3 = vld [vmem:[%s570_s2] sm:$0xff]  ;;  %396 = vmatpush3.xpose.msk.msra.mxu0 %vm56_vm0, %v35_v1 }
   0x6   :  { %16 = vsyncpa [#allocation4], 0  ;;  %48 = vperm.xlu0 %422, %v38_v3   ;;  %423 = vset.pattern.permute.xlu1 %v461_v5  ;;  %v39_v6 = vld [vmem:[%s570_s2 + $0x8] sm:$0xff]  ;;  %v43_v7 = vld [vmem:[%s574_s6] sm:$0xf]  ;;  %v462_v8 = vmov 0.0|0.0   ;;  %v228_v35 = vlaneseq }
   0x7   :  { %407 = vmatprep.subr.bf16.mxu1 %v462_v8  ;;  %vm463_vm1 = vmmov 0   ;;  %v464_v9 = vmov 0.0   ;;  %v41_v10 = vld [vmem:[%s572_s4] sm:$0xff]  ;;  %v465_v12 = vmov 2   ;;  %v466_v13 = vmov 5  }
   0x8   :  { %398 = vmatmul.mubr.msk.f32.vlgmr.msra.gmra.mrb[0].mxu0 %vm56_vm0, %v37_v4  ;;  %404 = vmatprep.mubr.msk.f32.mxu1 %vm463_vm1, %v464_v9  ;;  %v42_v11 = vld [vmem:[%s573_s5] sm:$0xf]  ;;  %v467_v14 = vmov 1   ;;  %v468_v16 = vmov 3   ;;  %v469_v17 = vmov 4   ;;  %v470_v18 = vmov 6  }
   0x9   :  { %145 = vperm.xlu1 %423, %v41_v10   ;;  %v44_v15 = vld [vmem:[%s575_s7] sm:$0x1]  ;;  %v471_v19 = vmov 7   ;;  %vm148_vm2 = vcmask 130048   ;;  %v229_v37 = vshrl.u32 %v228_v35, 7  ;;  %vm369_vm3 = vcmask 57344  }
   0xa   :  { %53 = vperm.xlu0 %422, %v39_v6   ;;  %v45_v20 = vld [vmem:[#allocation2] sm:$0x1] }
   0xb   :  { %v40_v30 = vld [vmem:[%s571_s3] sm:$0xff]  ;;  %v230_v43 = vsub.s32 0, %v229_v37  ;;  %v245_v44 = vsub.s32 1, %v229_v37  ;;  %v255_v46 = vsub.s32 2, %v229_v37  ;;  %v265_v48 = vsub.s32 3, %v229_v37  ;;  %s472_s3 = smov [#allocation3]  }
   0xc   :  { %v275_v54 = vsub.s32 4, %v229_v37  ;;  %v285_v58 = vsub.s32 5, %v229_v37  ;;  %v295_v61 = vsub.s32 6, %v229_v37  ;;  %v305_v3 = vsub.s32 7, %v229_v37  ;;  %s377_s7 = sshll.u32 %s472_s3, 4  ;;  %s378_s7 = int_to_ptr.vmem [resolvable:$true] %s377_s7 }
   0xd   :  { %225 = vperm.xlu1 %423, %v42_v11   ;;  %s437_s24 = scalar_lea.vmem %s378_s7, 16  ;;  %s441_s25 = scalar_lea.vmem %s378_s7, 32 }
   0xe   :  { %235 = vperm.xlu0 %422, %v43_v7   ;;  %p438_p0 = scmp.ne.s32.totalorder %s378_s7, %s437_s24  ;;  %p442_p1 = scmp.lt.s32.totalorder %s378_s7, %s378_s7 }
   0xf   :  { %p443_p2 = scmp.lt.s32.totalorder %s441_s25, %s437_s24 }
  0x11   :  { %424 = vset.pattern.permute.xlu1 %v467_v14  ;;  %p444_p3 = por %p443_p2, %p442_p1 }
  0x12   :  { %425 = vset.pattern.permute.xlu0 %v465_v12  ;;  %240 = vperm.xlu1 %424, %v42_v11  }
  0x13   :  { %250 = vperm.xlu0 %425, %v42_v11   ;;  %p445_p4 = pnand %p444_p3, %p438_p0 }
  0x16   :  { %426 = vset.pattern.permute.xlu1 %v468_v16 }
  0x17   :  { %428 = vset.pattern.permute.xlu0 %v466_v13  ;;  %260 = vperm.xlu1 %426, %v42_v11  }
  0x18   :  { %280 = vperm.xlu0 %428, %v42_v11  }
  0x1b   :  { %427 = vset.pattern.permute.xlu1 %v469_v17 }
  0x1c   :  { %431 = vset.pattern.permute.xlu0 %v461_v5  ;;  %270 = vperm.xlu1 %427, %v42_v11  }
  0x1d   :  { %312 = vperm.xlu0 %431, %v44_v15  }
  0x20   :  { %429 = vset.pattern.permute.xlu1 %v470_v18 }
  0x21   :  { %434 = vset.pattern.permute.xlu0 %v465_v12  ;;  %290 = vperm.xlu1 %429, %v42_v11  }
  0x22   :  { %344 = vperm.xlu0 %434, %v44_v15  }
  0x25   :  { %430 = vset.pattern.permute.xlu1 %v471_v19 }
  0x26   :  { %436 = vset.pattern.permute.xlu0 %v468_v16  ;;  %300 = vperm.xlu1 %430, %v42_v11  }
  0x2a   :  { %432 = vset.pattern.permute.xlu1 %v467_v14 }
  0x2b   :  { %331 = vperm.xlu1 %432, %v44_v15  }
  0x2f   :  { %433 = vset.pattern.permute.xlu1 %v461_v5 }
  0x30   :  { %322 = vperm.xlu1 %433, %v45_v20  }
  0x34   :  { %435 = vset.pattern.permute.xlu1 %v468_v16 }
  0x35   :  { %357 = vperm.xlu1 %435, %v44_v15  }
  0x85   :  { %v49_v21 = vpop.permute.xlu0 %48 }
  0x88   :  { %v146_v31 = vpop.permute.xlu1 %145 }
  0x89   :  { %v54_v22 = vpop.permute.xlu0 %53 }
  0x8c   :  { %v226_v32 = vpop.permute.xlu1 %225 }
  0x8d   :  { %v236_v38 = vpop.permute.xlu0 %235 }
  0x91   :  { %v241_v33 = vpop.permute.xlu1 %240 }
  0x92   :  { %v251_v47 = vpop.permute.xlu0 %250 }
  0x96   :  { %v261_v34 = vpop.permute.xlu1 %260 }
  0x97   :  { %v281_v59 = vpop.permute.xlu0 %280 }
  0x9b   :  { %v271_v36 = vpop.permute.xlu1 %270 }
  0x9c   :  { %v313_v5 = vpop.permute.xlu0 %312 }
  0xa0   :  { %v291_v40 = vpop.permute.xlu1 %290 }
  0xa1   :  { %v345_v15 = vpop.permute.xlu0 %344 }
  0xa2   :  { %v350_v20 = vrot.slane %v345_v15, %v230_v43 }
  0xa5   :  { %v301_v51 = vpop.permute.xlu1 %300 }
  0xaa   :  { %v332_v60 = vpop.permute.xlu1 %331 }
  0xaf   :  { %v323_v9 = vpop.permute.xlu1 %322 }
  0xb4   :  { %v358_v18 = vpop.permute.xlu1 %357 }
  0xdb   :  { %v399_v23 = vpop.f32.mrb[0].mxu0 }
  0xdc   :  { %v138_v24 = vadd.f32 %v399_v23, %v54_v22  ;;  %v132_v25 = vpop.f32.mrb[1].mxu0  ;;  %v337_v22 = vrot.slane %v332_v60, %v230_v43  ;;  %v318_v23 = vrot.slane %v313_v5, %v230_v43 }
  0xdd   :  { %v133_v26 = vadd.f32 %v132_v25, %v49_v21 }
  0xde   :  { %v142_v27 = vmax.f32 %v138_v24, 0.0  ;;  %v363_v24 = vrot.slane %v358_v18, %v230_v43 }
  0xdf   :  { %v141_v28 = vmax.f32 %v133_v26, 0.0  ;;  %v328_v26 = vrot.slane %v323_v9, %v230_v43 }
  0xe1   :  { %v408_v29 = vpack.c.bf16 %v142_v27, %v141_v28 }
  0xe3   :  { %409 = vmatpush3.bf16.msra.mxu1 %v408_v29 }
  0xe6   :  { %405 = vmatmul.mubr.msk.f32.vlgmr.msra.gmra.mrb[0].mxu1 %vm148_vm2, %v40_v30 }
 0x1b9   :  { %v218_v39 = vpop.f32.mrb[0].mxu1 }
 0x1ba   :  { %v219_v41 = vadd.f32 %v218_v39, %v146_v31  ;;  %v406_v42 = vpop.f32.mrb[1].mxu1 }
 0x1bc   :  { %v222_v45 = vmax.f32 %v219_v41, 0.0 }
 0x1be   :  { %v231_v49 = vrot.slane %v222_v45, %v230_v43  ;;  %v246_v50 = vrot.slane %v222_v45, %v245_v44  ;;  %v256_v53 = vrot.slane %v222_v45, %v255_v46  ;;  %v266_v57 = vrot.slane %v222_v45, %v265_v48 }
 0x1bf   :  { %v276_v0 = vrot.slane %v222_v45, %v275_v54  ;;  %v286_v4 = vrot.slane %v222_v45, %v285_v58  ;;  %v296_v6 = vrot.slane %v222_v45, %v295_v61  ;;  %v306_v10 = vrot.slane %v222_v45, %v305_v3 }
 0x1c0   :  { %v232_v52 = vmul.f32 %v231_v49, %v226_v32  ;;  %v247_v56 = vmul.f32 %v246_v50, %v241_v33  ;;  %v257_v63 = vmul.f32 %v256_v53, %v251_v47  ;;  %v267_v2 = vmul.f32 %v266_v57, %v261_v34 }
 0x1c1   :  { %v277_v8 = vmul.f32 %v276_v0, %v271_v36  ;;  %v287_v12 = vmul.f32 %v286_v4, %v281_v59  ;;  %v297_v13 = vmul.f32 %v296_v6, %v291_v40  ;;  %v307_v16 = vmul.f32 %v306_v10, %v301_v51 }
 0x1c2   :  { %v238_v55 = vadd.f32 %v236_v38, %v232_v52 }
 0x1c4   :  { %v248_v62 = vadd.f32 %v247_v56, %v238_v55 }
 0x1c6   :  { %v258_v1 = vadd.f32 %v257_v63, %v248_v62 }
 0x1c8   :  { %v268_v7 = vadd.f32 %v267_v2, %v258_v1 }
 0x1ca   :  { %v278_v11 = vadd.f32 %v277_v8, %v268_v7 }
 0x1cc   :  { %v288_v14 = vadd.f32 %v287_v12, %v278_v11 }
 0x1ce   :  { %v298_v17 = vadd.f32 %v297_v13, %v288_v14 }
 0x1d0   :  { %v308_v19 = vadd.f32 %v307_v16, %v298_v17 }
 0x1d2   :  { %v309_v21 = vmax.f32 %v308_v19, 0.0 }
 0x1d4   :  { %v338_v25 = vmul.f32 %v337_v22, %v309_v21  ;;  %v319_v27 = vmul.f32 %v318_v23, %v309_v21  ;;  %v351_v28 = vmul.f32 %v350_v20, %v309_v21  ;;  %v364_v31 = vmul.f32 %v363_v24, %v309_v21 }
 0x1d6   :  { %v340_v29 = vrot.slane %v338_v25, 1  ;;  %v329_v30 = vadd.f32 %v328_v26, %v319_v27  ;;  %v353_v33 = vrot.slane %v351_v28, 2  ;;  %v366_v34 = vrot.slane %v364_v31, 3 }
 0x1d8   :  { %v342_v32 = vadd.f32 %v340_v29, %v329_v30 }
 0x1da   :  { %v355_v35 = vadd.f32 %v353_v33, %v342_v32 }
 0x1dc   :  { %v368_v36 = vadd.f32 %v366_v34, %v355_v35 }
 0x1de   :  { %370 = vst.msk [vmem:[#allocation3] sm:$0x1] %vm369_vm3, %v368_v36 }
 0x1df   :  { %448 = shalt.err (!%p445_p4)
}
 0x1e0   :  { %s449_s28 = scalar_lea.hbm %s577_s9, 16 }
 0x1e1   :  { %p450_p5 = scmp.ne.s32.totalorder %s577_s9, %s449_s28  ;;  %p453_p6 = scmp.lt.u32.totalorder %s449_s28, %s577_s9 }
 0x1e3   :  { %p455_p7 = pnand %p453_p6, %p450_p5 }
 0x1e5   :  { %458 = shalt.err (!%p455_p7)
}
 0x1e6   :  { %380 = dma.vmem_to_hbm [thread:$0]  %s378_s7, 16, %s577_s9, [#allocation4]  }
 0x1e7   :  { %459 = dma.done.wait [#allocation4], 16  }
 0x1e8   :  { %460 = vsyncadd [#allocation4], 4294967280 }
 0x1e9   :  { %384 = vsyncpa [#allocation4], 1 }

</bundles_post_ra>
